<compile_context>
chip_gen: v7x
topology: tpu7x:2x2x1
jax: 0.10.0
libtpu: 0.0.40
codegen_flags: <defaults>
</compile_context>

<pallas_src>
import jax
import jax.numpy as jnp
from jax import lax
from jax.experimental import pallas as pl
from jax.experimental.pallas import tpu as pltpu

EPS = 1e-5  # nn.InstanceNorm1d default eps


def _round_up(a, m):
    return ((a + m - 1) // m) * m


def _pick_bm(B, D, C):
    """Largest batch tile (multiple of 8, <=1024) whose double-buffered x
    stream + resident (double-buffered) weight/bias fits a ~24 MiB budget."""
    budget = 24 * 1024 * 1024
    fixed = 2 * (D * C * 4) + 4 * (C * 4) + 64 * 1024  # weight + bias + center + slack
    per_row = 2 * D * 4                                # double-buffered x bytes / row
    cap = (budget - fixed) // max(per_row, 1)
    cap = max(8, (cap // 8) * 8)
    cap = min(cap, 1024)
    return min(cap, _round_up(B, 8))


def _make_kernel(B, bm, D):
    """Builds the kernel with static sizes captured in the closure."""
    inv_d = 1.0 / D

    def kernel(x_ref, wt_ref, b_ref, center_ref, out_ref, sse_ref):
        i = pl.program_id(0)

        x = x_ref[...]            # (bm, D)  batch tile (pipelined)
        wt = wt_ref[...]          # (D, C)   pre-transposed weight (resident)
        bias = b_ref[...]         # (1, C)
        center = center_ref[...]  # (1, C)   precomputed in the wrapper

        # ---- InstanceNorm1d(1): per-row norm over D (two-pass stats) -------
        mean = jnp.sum(x, axis=1, keepdims=True) * inv_d
        xc = x - mean
        var = jnp.sum(xc * xc, axis=1, keepdims=True) * inv_d  # biased variance
        xn = xc * lax.rsqrt(var + EPS)                          # rsqrt -> EUP slot

        # ---- myfc: (bm, D) @ (D, C) + bias — canonical MXU layout ----------
        h = jnp.dot(xn, wt, preferred_element_type=jnp.float32) + bias  # (bm, C)

        # ---- argmax over dim=1, first-occurrence tie-break ------------------
        C = h.shape[1]
        col = lax.broadcasted_iota(jnp.int32, h.shape, 1)
        maxv = jnp.max(h, axis=1, keepdims=True)
        cand = jnp.where(h == maxv, col, jnp.int32(C))
        out_ref[...] = jnp.min(cand, axis=1, keepdims=True)     # (bm, 1) int32

        # ---- partial MSE numerator for this tile (padded rows masked) -------
        row = lax.broadcasted_iota(jnp.int32, (bm, 1), 0) + i * bm
        valid = row < B
        diff = jnp.where(valid, h - center, 0.0)
        part = jnp.sum(diff * diff)                             # scalar
        lane = lax.broadcasted_iota(jnp.int32, (1, 128), 1)
        sse_ref[...] = jnp.where(lane == 0, part, 0.0)          # lane-dense block

    return kernel


def multi_center_forward(x, weight, bias):
    """x: (B, D) f32; weight: (C, D) f32 (PyTorch layout); bias: (C,) f32.

    Returns (out: (B,) int32, loss: () float32)."""
    B, D = x.shape
    C = weight.shape[0]
    assert C <= D, "forward indexes weight.T rows with an argmax over C; needs C <= D"

    # Pre-transpose the Linear weight once in XLA so the kernel contracts the
    # canonical (M,K)x(K,N) layout (no in-kernel XLU transpose).
    w_t = jnp.transpose(weight, (1, 0))          # (D, C)
    bias2 = bias.reshape(1, C)

    # ---- center = weight.T[argmax(h1[0]), :] — tiny row-0-only XLA op -------
    # Same math as the kernel (two-pass InstanceNorm + matmul + bias).
    x0 = x[0:1, :]
    mean0 = jnp.sum(x0, axis=1, keepdims=True) * (1.0 / D)
    xc0 = x0 - mean0
    var0 = jnp.sum(xc0 * xc0, axis=1, keepdims=True) * (1.0 / D)
    xn0 = xc0 * lax.rsqrt(var0 + EPS)
    h0 = xn0 @ w_t + bias2                                       # (1, C)
    idx0 = jnp.argmax(h0[0])
    center = lax.dynamic_index_in_dim(w_t, idx0, axis=0, keepdims=True)  # (1, C)

    # ---- batch tiling: big pipelined tiles, pad B up to a multiple of bm ----
    bm = _pick_bm(B, D, C)
    B_pad = _round_up(B, bm)
    x_p = jnp.pad(x, ((0, B_pad - B), (0, 0))) if B_pad != B else x
    G = B_pad // bm

    # Shape-derived scoped-VMEM budget (double-buffered x/weight/bias/center
    # + output blocks), capped so it is safe on v7x's 64 MiB VMEM.
    est = (2 * bm * D * 4 + 2 * D * C * 4 + 4 * C * 4
           + 2 * bm * 4 + 2 * 128 * 4)
    vmem_limit = int(min(32 << 20, max(16 << 20, est + (2 << 20))))

    kernel = _make_kernel(B, bm, D)

    out2d, sse_parts = pl.pallas_call(
        kernel,
        out_shape=(
            jax.ShapeDtypeStruct((B_pad, 1), jnp.int32),     # per-row argmax
            jax.ShapeDtypeStruct((1, G * 128), jnp.float32), # per-step partial SSE
        ),
        grid_spec=pltpu.PrefetchScalarGridSpec(
            num_scalar_prefetch=0,
            grid=(G,),
            in_specs=[
                pl.BlockSpec((bm, D), lambda i: (i, 0)),   # x batch tile (pipelined)
                pl.BlockSpec((D, C), lambda i: (0, 0)),    # weight, resident
                pl.BlockSpec((1, C), lambda i: (0, 0)),    # bias, resident
                pl.BlockSpec((1, C), lambda i: (0, 0)),    # center, resident
            ],
            out_specs=(
                pl.BlockSpec((bm, 1), lambda i: (i, 0)),
                pl.BlockSpec((1, 128), lambda i: (0, i)),
            ),
        ),
        compiler_params=pltpu.CompilerParams(
            # No cross-step dependency -> megacore sharding of the batch axis.
            dimension_semantics=("parallel",),
            vmem_limit_bytes=vmem_limit,
        ),
    )(x_p, w_t, bias2, center)

    out = out2d[:B, 0]
    loss = jnp.sum(sse_parts) * (1.0 / (B * C))
    return out, loss


def _reference(x, weight, bias):
    mean = jnp.mean(x, axis=1, keepdims=True)
    var = jnp.mean((x - mean) ** 2, axis=1, keepdims=True)
    xn = (x - mean) / jnp.sqrt(var + EPS)
    h = xn @ weight.T + bias
    out = jnp.argmax(h, axis=1).astype(jnp.int32)
    center = weight[:, out[0]]              # = weight.T[out[0], :]
    loss = jnp.mean((h - center[None, :]) ** 2)
    return out, loss


if __name__ == "__main__":
    B, D, C = 4, 32, 8          # batch, inc, center_num  (C <= D required)
    key = jax.random.PRNGKey(0)
    kx, kw, kb = jax.random.split(key, 3)

    x = jax.random.normal(kx, (B, D), dtype=jnp.float32)
    bound = 1.0 / (D ** 0.5)    # deterministic stand-in for nn.Linear init
    weight = jax.random.uniform(kw, (C, D), jnp.float32, -bound, bound)
    bias = jax.random.uniform(kb, (C,), jnp.float32, -bound, bound)

    out, loss = multi_center_forward(x, weight, bias)
    jax.block_until_ready((out, loss))

    ref_out, ref_loss = _reference(x, weight, bias)
    assert bool(jnp.all(out == ref_out)), (out, ref_out)
    assert bool(jnp.abs(loss - ref_loss) < 1e-4), (loss, ref_loss)

    print("KERNEL_OK")
</pallas_src>

<mosaic_0001>
module attributes {stable_mosaic.version = 11 : i64} {
  func.func @kernel(%arg0: i32, %arg1: memref<8x32xf32, #tpu.memory_space<vmem>>, %arg2: memref<32x8xf32, #tpu.memory_space<vmem>>, %arg3: memref<1x8xf32, #tpu.memory_space<vmem>>, %arg4: memref<1x8xf32, #tpu.memory_space<vmem>>, %arg5: memref<8x1xi32, #tpu.memory_space<vmem>>, %arg6: memref<1x128xf32, #tpu.memory_space<vmem>>) attributes {dimension_semantics = [#tpu.dimension_semantics<parallel>], iteration_bounds = array<i64: 1>, scalar_prefetch = 0 : i64, scratch_operands = 0 : i64, tpu.core_type = #tpu.core_type<tc>, window_params = [{transform_indices = @transform_0, window_bounds = array<i64: 8, 32>}, {pipeline_mode = #tpu.pipeline_mode<synchronous>, transform_indices = @transform_1, window_bounds = array<i64: 32, 8>}, {pipeline_mode = #tpu.pipeline_mode<synchronous>, transform_indices = @transform_2, window_bounds = array<i64: 1, 8>}, {pipeline_mode = #tpu.pipeline_mode<synchronous>, transform_indices = @transform_3, window_bounds = array<i64: 1, 8>}, {transform_indices = @transform_4, window_bounds = array<i64: 8, 1>}, {transform_indices = @transform_5, window_bounds = array<i64: 1, 128>}]} {
    %c0 = arith.constant 0 : index
    %c0_0 = arith.constant 0 : index
    %0 = vector.load %arg1[%c0, %c0_0] : memref<8x32xf32, #tpu.memory_space<vmem>>, vector<8x32xf32>
    %c0_1 = arith.constant 0 : index
    %c0_2 = arith.constant 0 : index
    %1 = vector.load %arg2[%c0_1, %c0_2] : memref<32x8xf32, #tpu.memory_space<vmem>>, vector<32x8xf32>
    %c0_3 = arith.constant 0 : index
    %c0_4 = arith.constant 0 : index
    %2 = vector.load %arg3[%c0_3, %c0_4] : memref<1x8xf32, #tpu.memory_space<vmem>>, vector<1x8xf32>
    %c0_5 = arith.constant 0 : index
    %c0_6 = arith.constant 0 : index
    %3 = vector.load %arg4[%c0_5, %c0_6] : memref<1x8xf32, #tpu.memory_space<vmem>>, vector<1x8xf32>
    %cst = arith.constant dense<0.000000e+00> : vector<8xf32>
    %4 = vector.multi_reduction <add>, %0, %cst [1] : vector<8x32xf32> to vector<8xf32>
    %5 = vector.shape_cast %4 : vector<8xf32> to vector<8x1xf32>
    %cst_7 = arith.constant 3.125000e-02 : f32
    %6 = vector.broadcast %cst_7 : f32 to vector<8x1xf32>
    %7 = arith.mulf %5, %6 : vector<8x1xf32>
    %8 = vector.broadcast %7 : vector<8x1xf32> to vector<8x32xf32>
    %9 = arith.subf %0, %8 : vector<8x32xf32>
    %10 = arith.mulf %9, %9 : vector<8x32xf32>
    %cst_8 = arith.constant dense<0.000000e+00> : vector<8xf32>
    %11 = vector.multi_reduction <add>, %10, %cst_8 [1] : vector<8x32xf32> to vector<8xf32>
    %12 = vector.shape_cast %11 : vector<8xf32> to vector<8x1xf32>
    %cst_9 = arith.constant 3.125000e-02 : f32
    %13 = vector.broadcast %cst_9 : f32 to vector<8x1xf32>
    %14 = arith.mulf %12, %13 : vector<8x1xf32>
    %cst_10 = arith.constant 9.99999974E-6 : f32
    %15 = vector.broadcast %cst_10 : f32 to vector<8x1xf32>
    %16 = arith.addf %14, %15 : vector<8x1xf32>
    %17 = math.rsqrt %16 : vector<8x1xf32>
    %18 = vector.broadcast %17 : vector<8x1xf32> to vector<8x32xf32>
    %19 = arith.mulf %9, %18 : vector<8x32xf32>
    %cst_11 = arith.constant dense<0.000000e+00> : vector<8x8xf32>
    %20 = tpu.matmul %19, %1, %cst_11 {dimension_numbers = #tpu.dot_dimension_numbers<[1], [0], [0], [1], [0, 0, 1, 1], [], []>} : vector<8x32xf32>, vector<32x8xf32>, vector<8x8xf32> -> vector<8x8xf32>
    %21 = vector.broadcast %2 : vector<1x8xf32> to vector<8x8xf32>
    %22 = arith.addf %20, %21 : vector<8x8xf32>
    %23 = tpu.iota {dimensions = array<i32: 1>} : vector<8x8xi32>
    %cst_12 = arith.constant dense<0xFF800000> : vector<8xf32>
    %24 = vector.multi_reduction <maximumf>, %22, %cst_12 [1] : vector<8x8xf32> to vector<8xf32>
    %25 = vector.shape_cast %24 : vector<8xf32> to vector<8x1xf32>
    %26 = vector.broadcast %25 : vector<8x1xf32> to vector<8x8xf32>
    %27 = arith.cmpf oeq, %22, %26 : vector<8x8xf32>
    %c8_i32 = arith.constant 8 : i32
    %28 = vector.broadcast %c8_i32 : i32 to vector<8x8xi32>
    %29 = arith.select %27, %23, %28 : vector<8x8xi1>, vector<8x8xi32>
    %cst_13 = arith.constant dense<2147483647> : vector<8xi32>
    %30 = vector.multi_reduction <minsi>, %29, %cst_13 [1] : vector<8x8xi32> to vector<8xi32>
    %31 = vector.shape_cast %30 : vector<8xi32> to vector<8x1xi32>
    %c0_14 = arith.constant 0 : index
    %c0_15 = arith.constant 0 : index
    %32 = vector.load %arg5[%c0_14, %c0_15] : memref<8x1xi32, #tpu.memory_space<vmem>>, vector<8x1xi32>
    tpu.vector_store %arg5[%c0_14, %c0_15], %31 {strides = array<i32>} : memref<8x1xi32, #tpu.memory_space<vmem>>, vector<8x1xi32>,
    %33 = tpu.iota {dimensions = array<i32: 0>} : vector<8x1xi32>
    %c8_i32_16 = arith.constant 8 : i32
    %34 = arith.muli %arg0, %c8_i32_16 : i32
    %35 = vector.broadcast %34 : i32 to vector<8x1xi32>
    %36 = arith.addi %33, %35 : vector<8x1xi32>
    %c4_i32 = arith.constant 4 : i32
    %37 = vector.broadcast %c4_i32 : i32 to vector<8x1xi32>
    %38 = arith.cmpi slt, %36, %37 : vector<8x1xi32>
    %39 = vector.broadcast %3 : vector<1x8xf32> to vector<8x8xf32>
    %40 = arith.subf %22, %39 : vector<8x8xf32>
    %cst_17 = arith.constant 0.000000e+00 : f32
    %41 = vector.shape_cast %38 : vector<8x1xi1> to vector<8x1xi1>
    %42 = vector.broadcast %41 : vector<8x1xi1> to vector<8x8xi1>
    %43 = vector.broadcast %cst_17 : f32 to vector<8x8xf32>
    %44 = arith.select %42, %40, %43 : vector<8x8xi1>, vector<8x8xf32>
    %45 = arith.mulf %44, %44 : vector<8x8xf32>
    %46 = vector.shape_cast %45 : vector<8x8xf32> to vector<1x8x8xf32>
    %cst_18 = arith.constant dense<0.000000e+00> : vector<1xf32>
    %47 = vector.multi_reduction <add>, %46, %cst_18 [1, 2] : vector<1x8x8xf32> to vector<1xf32>
    %48 = vector.shape_cast %47 : vector<1xf32> to vector<1x1x1xf32>
    %49 = vector.extract %48[0, 0, 0] : f32 from vector<1x1x1xf32>
    %50 = tpu.iota {dimensions = array<i32: 1>} : vector<1x128xi32>
    %c0_i32 = arith.constant 0 : i32
    %51 = vector.broadcast %c0_i32 : i32 to vector<1x128xi32>
    %52 = arith.cmpi eq, %50, %51 : vector<1x128xi32>
    %cst_19 = arith.constant 0.000000e+00 : f32
    %53 = vector.broadcast %49 : f32 to vector<1x128xf32>
    %54 = vector.broadcast %cst_19 : f32 to vector<1x128xf32>
    %55 = arith.select %52, %53, %54 : vector<1x128xi1>, vector<1x128xf32>
    %c0_20 = arith.constant 0 : index
    %c0_21 = arith.constant 0 : index
    %56 = vector.load %arg6[%c0_20, %c0_21] : memref<1x128xf32, #tpu.memory_space<vmem>>, vector<1x128xf32>
    tpu.vector_store %arg6[%c0_20, %c0_21], %55 {strides = array<i32>} : memref<1x128xf32, #tpu.memory_space<vmem>>, vector<1x128xf32>,
    return
  }
  func.func @transform_0(%arg0: i32) -> (i32, i32) {
    %c0_i32 = arith.constant 0 : i32
    %c0_i32_0 = arith.constant 0 : i32
    return %arg0, %c0_i32 : i32, i32
  }
  func.func @transform_1(%arg0: i32) -> (i32, i32) {
    %c0_i32 = arith.constant 0 : i32
    %c0_i32_0 = arith.constant 0 : i32
    %c0_i32_1 = arith.constant 0 : i32
    return %c0_i32, %c0_i32_0 : i32, i32
  }
  func.func @transform_2(%arg0: i32) -> (i32, i32) {
    %c0_i32 = arith.constant 0 : i32
    %c0_i32_0 = arith.constant 0 : i32
    %c0_i32_1 = arith.constant 0 : i32
    return %c0_i32, %c0_i32_0 : i32, i32
  }
  func.func @transform_3(%arg0: i32) -> (i32, i32) {
    %c0_i32 = arith.constant 0 : i32
    %c0_i32_0 = arith.constant 0 : i32
    %c0_i32_1 = arith.constant 0 : i32
    return %c0_i32, %c0_i32_0 : i32, i32
  }
  func.func @transform_4(%arg0: i32) -> (i32, i32) {
    %c0_i32 = arith.constant 0 : i32
    %c0_i32_0 = arith.constant 0 : i32
    return %arg0, %c0_i32 : i32, i32
  }
  func.func @transform_5(%arg0: i32) -> (i32, i32) {
    %c0_i32 = arith.constant 0 : i32
    %c0_i32_0 = arith.constant 0 : i32
    return %c0_i32, %arg0 : i32, i32
  }
}

</mosaic_0001>

<bundles_post_ra>
// kernel: tpu_custom_call.1
= control target key start
LH: loop header
LB: loop body
LE: loop exit
PB: predicated region body
PF: predicated region fallthrough
CT: control target
= control target key end

     0   :  { %vm27_vm0 = vcmask 261120   ;;  %s327_s0 = inlined_call_operand.vmem [shape: f32[8,32], index: 0, kind: input, shape index: {}]   ;;  %s328_s1 = inlined_call_operand.vmem [shape: f32[32,8], index: 1, kind: input, shape index: {}]   ;;  %s329_s2 = inlined_call_operand.vmem [shape: f32[1,8], index: 2, kind: input, shape index: {}]   ;;  %s330_s3 = inlined_call_operand.vmem [shape: f32[1,8], index: 3, kind: input, shape index: {}]   ;;  %s331_s4 = inlined_call_operand.vmem [shape: s32[8,1], index: 4, kind: output, shape index: {0}]   ;;  %s332_s5 = inlined_call_operand.hbm [shape: f32[1,128], index: 5, kind: output, shape index: {1}]  }
   0x1   :  { %v20_v0 = vld [vmem:[%s327_s0] sm:$0xff] }
   0x2   :  { %11 = vsyncpa [#allocation3], 0  ;;  %v28_v1 = vsel %vm27_vm0, %v20_v0, 0.0  ;;  %v21_v7 = vld [vmem:[%s328_s1] sm:$0xff]  ;;  %v22_v8 = vld [vmem:[%s328_s1 + $0x8] sm:$0xff]  ;;  %v251_v10 = vmov 0.0|0.0   ;;  %v120_v20 = vlaneseq }
   0x3   :  { %29 = vadd.xlane.f32.xlu0 %v28_v1  ;;  %v23_v9 = vld [vmem:[%s328_s1 + $0x10] sm:$0xff]  ;;  %213 = vmatprep.subr.bf16.mxu0 %v251_v10  ;;  %v214_v11 = vpack.c.bf16 %v22_v8, %v21_v7  ;;  %v24_v12 = vld [vmem:[%s328_s1 + $0x18] sm:$0xff]  ;;  %vm252_vm1 = vmmov 0   ;;  %v253_v13 = vmov 0.0   ;;  %v194_v21 = vld [vmem:[%s329_s2] ss:$0 sm:$0xff] }
   0x4   :  { %210 = vmatprep.mubr.msk.f32.mxu0 %vm252_vm1, %v253_v13  ;;  %v217_v14 = vpack.c.bf16 %v24_v12, %v23_v9  ;;  %v146_v22 = vshrl.u32 %v120_v20, 7  ;;  %vm122_vm2 = vcmask 64512   ;;  %v196_v24 = vld [vmem:[%s330_s3] ss:$0 sm:$0xff]  ;;  %v121_v32 = vand.u32 127, %v120_v20  ;;  %s254_s3 = smov [#allocation2]  }
   0x5   :  { %215 = vmatpush3.bf16.msra.mxu0 %v214_v11  ;;  %s184_s30 = sshll.u32 %s254_s3, 4  ;;  %s185_s30 = int_to_ptr.vmem [resolvable:$true] %s184_s30 }
   0x6   :  { %216 = vmatprep.subr.bf16.mxu0 %v251_v10  ;;  %vm150_vm3 = vcmp.lt.s32.totalorder %v146_v22, 4  ;;  %vm172_vm5 = vcmp.eq.s32.totalorder %v121_v32, 0  ;;  %s227_s6 = scalar_lea.vmem %s185_s30, 16  ;;  %s231_s7 = scalar_lea.vmem %s185_s30, 32 }
   0x7   :  { %p228_p0 = scmp.ne.s32.totalorder %s185_s30, %s227_s6  ;;  %p232_p1 = scmp.lt.s32.totalorder %s185_s30, %s185_s30 }
   0x8   :  { %p233_p2 = scmp.lt.s32.totalorder %s231_s7, %s227_s6 }
   0x9   :  { %218 = vmatpush3.bf16.msra.mxu0 %v217_v14 }
   0xa   :  { %p234_p3 = por %p233_p2, %p232_p1 }
   0xc   :  { %p235_p4 = pnand %p234_p3, %p228_p0 }
  0x90   :  { %v30_v2 = vpop.xlane.xlu0 %29 }
  0x91   :  { %v31_v3 = vmul.f32 0.03125, %v30_v2 }
  0x93   :  { %v32_v4 = vsub.f32 %v20_v0, %v31_v3 }
  0x95   :  { %v33_v5 = vmul.f32 %v32_v4, %v32_v4 }
  0x97   :  { %v34_v6 = vsel %vm27_vm0, %v33_v5, 0.0 }
  0x98   :  { %35 = vadd.xlane.f32.xlu0 %v34_v6 }
 0x125   :  { %v36_v15 = vpop.xlane.xlu0 %35 }
 0x126   :  { %v37_v16 = vmul.f32 0.03125, %v36_v15 }
 0x128   :  { %v38_v17 = vadd.f32 1e-05, %v37_v16 }
 0x12a   :  { %225 = vrsqrt.f32 %v38_v17 }
 0x134   :  { %v226_v18 = vpop.eup %225 }
 0x135   :  { %v40_v19 = vmul.f32 %v226_v18, %v32_v4 }
 0x137   :  { %211 = vmatmul.mubr.msk.f32.vlgmr.msra.gmra.mrb[0].mxu0 %vm27_vm0, %v40_v19 }
 0x20a   :  { %v116_v23 = vpop.f32.mrb[0].mxu0 }
 0x20b   :  { %v117_v25 = vadd.f32 %v194_v21, %v116_v23  ;;  %v212_v26 = vpop.f32.mrb[1].mxu0 }
 0x20d   :  { %v123_v27 = vsel %vm122_vm2, %v117_v25, -inf  ;;  %v157_v28 = vsub.f32 %v117_v25, %v196_v24 }
 0x20e   :  { %124 = vmax.xlane.f32.xlu1 %v123_v27 }
 0x20f   :  { %v160_v29 = vsel %vm150_vm3, %v157_v28, 0.0 }
 0x210   :  { %v161_v30 = vmul.f32 %v160_v29, %v160_v29 }
 0x212   :  { %v162_v31 = vsel %vm122_vm2, %v161_v30, 0.0 }
 0x213   :  { %163 = vadd.xlane.f32.xlu0 %v162_v31 }
 0x29b   :  { %v125_v33 = vpop.xlane.xlu1 %124 }
 0x29c   :  { %vm126_vm4 = vcmp.eq.f32.partialorder %v117_v25, %v125_v33 }
 0x29d   :  { %v127_v34 = vsel %vm126_vm4, %v121_v32, 8 }
 0x29e   :  { %v128_v35 = vsel %vm122_vm2, %v127_v34, 2147483647 }
 0x29f   :  { %v130_v36 = vshra.s32 %v128_v35, 16  ;;  %v129_v47 = vand.u32 65535, %v128_v35 }
 0x2a0   :  { %v164_v37 = vpop.xlane.xlu0 %163 }
 0x2a1   :  { %v165_v38 = vrot.slane %v164_v37, 4  ;;  %v132_v39 = vcvt.s32.f32 %v130_v36  ;;  %v131_v49 = vcvt.s32.f32 %v129_v47 }
 0x2a3   :  { %v166_v40 = vadd.f32 %v165_v38, %v164_v37  ;;  %133 = vmin.xlane.f32.xlu1 %v132_v39 }
 0x2a5   :  { %v167_v41 = vrot.slane %v166_v40, 2 }
 0x2a7   :  { %v168_v42 = vadd.f32 %v167_v41, %v166_v40 }
 0x2a9   :  { %v169_v43 = vrot.slane %v168_v42, 1 }
 0x2ab   :  { %v170_v44 = vadd.f32 %v169_v43, %v168_v42 }
 0x2ad   :  { %219 = vpush %v170_v44 }
 0x2de   :  { %s220_s2 = spop %219 }
 0x2df   :  { %v173_v45 = vstv %s220_s2 }
 0x2e0   :  { %v174_v46 = vsel %vm172_vm5, %v173_v45, 0.0 }
 0x2e1   :  { %175 = vst [vmem:[#allocation2] sm:$0x1] %v174_v46 }
 0x330   :  { %v134_v48 = vpop.xlane.xlu1 %133 }
 0x331   :  { %vm135_vm6 = vcmp.eq.f32.partialorder %v132_v39, %v134_v48 }
 0x332   :  { %v136_v50 = vsel %vm135_vm6, %v131_v49, inf }
 0x333   :  { %137 = vmin.xlane.f32.xlu1 %v136_v50 }
 0x334   :  { %238 = shalt.err (!%p235_p4)
}
 0x335   :  { %s239_s10 = scalar_lea.hbm %s332_s5, 16 }
 0x336   :  { %p240_p5 = scmp.ne.s32.totalorder %s332_s5, %s239_s10  ;;  %p243_p6 = scmp.lt.u32.totalorder %s239_s10, %s332_s5 }
 0x338   :  { %p245_p7 = pnand %p243_p6, %p240_p5 }
 0x33a   :  { %248 = shalt.err (!%p245_p7)
}
 0x33b   :  { %187 = dma.vmem_to_hbm [thread:$0]  %s185_s30, 16, %s332_s5, [#allocation3]   ;;  %v140_v51 = vcvt.f32.s32 %v134_v48  ;;  %vm143_vm7 = vcmask 7168  }
 0x33d   :  { %v141_v53 = vshll.u32 %v140_v51, 16 }
 0x3c0   :  { %v138_v52 = vpop.xlane.xlu1 %137 }
 0x3c1   :  { %v139_v54 = vcvt.f32.s32 %v138_v52 }
 0x3c3   :  { %v142_v55 = vadd.s32 %v141_v53, %v139_v54 }
 0x3c5   :  { %144 = vst.msk [vmem:[%s331_s4] sm:$0xff] %vm143_vm7, %v142_v55 }
 0x3c6   :  { %249 = dma.done.wait [#allocation3], 16  }
 0x3c7   :  { %250 = vsyncadd [#allocation3], 4294967280 }
 0x3c8   :  { %193 = vsyncpa [#allocation3], 1 }

</bundles_post_ra>
